<compile_context>
chip_gen: v7x
topology: tpu7x:2x2x1
jax: 0.10.0
libtpu: 0.0.40
codegen_flags: <defaults>
</compile_context>

<pallas_src>
import functools
from itertools import chain, combinations_with_replacement
from typing import List, Sequence, Tuple

import jax
import jax.numpy as jnp
from jax import lax
from jax.experimental import pallas as pl
from jax.experimental.pallas import tpu as pltpu
import numpy as np

_LANES = 128


def _round_up(x: int, m: int) -> int:
    return ((x + m - 1) // m) * m


def _cdiv(a: int, b: int) -> int:
    return -(-a // b)


def _poly_combos(d: int, degree: int) -> Tuple[Tuple[int, ...], ...]:
    """All monomial index tuples of degree 1..degree over d variables."""
    return tuple(
        chain.from_iterable(
            combinations_with_replacement(range(d), k) for k in range(1, degree + 1)
        )
    )


def _feature_names(d: int, degree: int) -> List[str]:
    names = ["1"]
    for combo in _poly_combos(d, degree):
        names.append("*".join(f"x{i}" for i in combo))
    return names


def _native_sublanes(dtype: np.dtype) -> int:
    """Native second-minor tiling: f32 -> 8, bf16 -> 16, int8/fp8 -> 32."""
    return 8 * max(1, 4 // np.dtype(dtype).itemsize)


def _vmem_capacity_bytes() -> int:
    try:
        return int(pltpu.get_tpu_info().vmem_capacity_bytes)
    except Exception:
        return 64 << 20  # conservative fallback: v7x has the smallest per-TC VMEM


def _count_multiplies(schedule) -> int:
    needed = set()
    for combo, _ in schedule:
        for k in range(2, len(combo) + 1):
            needed.add(combo[:k])
    return len(needed)


def _make_kernel(schedule, slab_sublanes: int, n_slabs: int):
    """Kernel: x_ref (d, rows, 128) -> o_ref (F, rows, 128), slab-by-slab.

    `schedule` is a static tuple of (combo, out_row) in prefix-DFS order.
    Each slab covers `slab_sublanes` sublane rows (1–4 vregs per value), so the
    live set of cached prefix products stays tiny even for very large tiles.
    """
    need_const = any(len(c) == 0 for c, _ in schedule)

    def kernel(x_ref, o_ref):
        const = (
            jnp.ones((slab_sublanes, _LANES), o_ref.dtype) if need_const else None
        )  # hoisted out of the slab loop (broadcasts are not CSE'd)

        def slab_at(r0):
            cache = {}

            def var(i):  # (slab_sublanes, 128) f32 plane for variable i
                key = (i,)
                if key not in cache:
                    cache[key] = x_ref[i, pl.ds(r0, slab_sublanes), :].astype(
                        jnp.float32
                    )
                return cache[key]

            def monomial(combo):
                if len(combo) == 1:
                    return var(combo[0])
                if combo in cache:
                    return cache[combo]
                v = monomial(combo[:-1]) * var(combo[-1])
                cache[combo] = v
                return v

            for combo, out_row in schedule:  # static unroll, pure VPU work
                if len(combo) == 0:
                    v = const
                else:
                    v = monomial(combo).astype(o_ref.dtype)
                # Unmasked lane-dense store of one feature slab.
                o_ref[out_row, pl.ds(r0, slab_sublanes), :] = v

        if n_slabs == 1:
            slab_at(0)
        else:
            unroll = (n_slabs * max(len(schedule), 1)) <= 1024

            def body(s, carry):
                slab_at(pl.multiple_of(s * slab_sublanes, slab_sublanes))
                return carry

            lax.fori_loop(0, n_slabs, body, 0, unroll=unroll)

    return kernel


def _pick_tile_batch(n: int, d: int, f: int, in_dtype, out_dtype) -> int:
    """Batch elements per grid step, sized from VMEM and padding-aware."""
    in_dtype, out_dtype = np.dtype(in_dtype), np.dtype(out_dtype)
    slab = max(_native_sublanes(in_dtype), _native_sublanes(out_dtype))
    granule = slab * _LANES
    in_b, out_b = in_dtype.itemsize, out_dtype.itemsize

    cap = _vmem_capacity_bytes()
    budget = min(int(cap * 0.40), 48 << 20)  # double-buffered in+out tiles
    per_elem = max(1, 2 * (d * in_b + f * out_b))
    tile_max = max(granule, (budget // per_elem) // granule * granule)
    tile_max = min(tile_max, 32768)  # diminishing returns past ~32K elems/step

    n_eff = max(int(n), 1)
    steps = _cdiv(n_eff, tile_max)
    if steps == 1 and n_eff > granule:
        steps = 2  # grid >= 2 -> both TensorCores on v7x for this mem-bound kernel
    # Equalize steps to minimize padding waste while staying within the budget.
    tile = min(tile_max, _round_up(_cdiv(n_eff, steps), granule))
    return tile


@functools.lru_cache(maxsize=64)  # bounded: repeated update_basis() can't leak compiles
def _build_forward(
    combos: Tuple[Tuple[int, ...], ...],
    keep: Tuple[int, ...],
    d: int,
    tile_batch: int,
    transposed_output: bool,
    in_dtype: np.dtype,
    out_dtype: np.dtype,
):
    """Return a jitted forward for a fixed basis / tile / dtype config (cached)."""
    F = len(keep)
    rows = tile_batch // _LANES
    slab = max(_native_sublanes(in_dtype), _native_sublanes(out_dtype))
    assert rows % slab == 0
    n_slabs = rows // slab

    all_combos: Tuple[Tuple[int, ...], ...] = ((),) + combos  # prepend constant
    # Prefix-DFS (lexicographic) order: cached prefix products die quickly.
    schedule = tuple(
        sorted(((all_combos[j], row) for row, j in enumerate(keep)), key=lambda t: t[0])
    )
    kernel = _make_kernel(schedule, slab, n_slabs)

    in_b, out_b = np.dtype(in_dtype).itemsize, np.dtype(out_dtype).itemsize
    n_mults = _count_multiplies(schedule)

    cap = _vmem_capacity_bytes()
    per_elem = 2 * (d * in_b + F * out_b)  # double-buffered in+out tiles
    vmem_limit = int(min(cap * 0.7, max(32 << 20, per_elem * tile_batch + (16 << 20))))

    def fwd(x):  # x: (N, d); widening to f32 happens inside the kernel
        N = x.shape[0]
        n_pad = _round_up(max(N, 1), tile_batch)
        xt = jnp.swapaxes(x, 0, 1)  # (d, N) — cheap wrapper-side layout plumbing
        if n_pad != N:
            xt = jnp.pad(xt, ((0, 0), (0, n_pad - N)))
        x3 = xt.reshape(d, n_pad // _LANES, _LANES)

        out3 = pl.pallas_call(
            kernel,
            out_shape=jax.ShapeDtypeStruct((F, n_pad // _LANES, _LANES), out_dtype),
            grid_spec=pltpu.PrefetchScalarGridSpec(
                num_scalar_prefetch=0,
                grid=(n_pad // tile_batch,),
                in_specs=[pl.BlockSpec((d, rows, _LANES), lambda i: (0, i, 0))],
                out_specs=pl.BlockSpec((F, rows, _LANES), lambda i: (0, i, 0)),
            ),
            compiler_params=pltpu.CompilerParams(
                dimension_semantics=("parallel",),  # shards grid across TCs on v7x
                vmem_limit_bytes=vmem_limit,
            ),
            cost_estimate=pl.CostEstimate(
                flops=int(n_pad) * n_mults,
                transcendentals=0,
                bytes_accessed=int(n_pad) * (d * in_b + F * out_b),
            ),
        )(x3)

        phi_t = out3.reshape(F, n_pad)[:, :N]  # (F, N)
        if transposed_output:
            return phi_t
        # TODO(synk): this XLA transpose re-reads + re-writes Phi in HBM;
        # consumers that can take Phi^T (or apply_weights) should do so.
        return jnp.swapaxes(phi_t, 0, 1)  # (N, F), matches the PyTorch contract

    return jax.jit(fwd)


class SparsePolynomialFeatures:
    """JAX/Pallas port of a concrete SparseFeaturesLibrary (polynomial basis)."""

    def __init__(self, d: int, degree: int = 2):
        self.d = d
        self.degree = degree
        self.combos = _poly_combos(d, degree)
        self._num_features_full = 1 + len(self.combos)
        # Dense basis until update_basis().
        self.sparse_index: Tuple[int, ...] = tuple(range(self._num_features_full))

    # --- SparseFeaturesLibrary API -----------------------------------------
    @property
    def num_features(self) -> int:
        return len(self.sparse_index)

    @property
    def feature_names(self) -> List[str]:
        names = _feature_names(self.d, self.degree)
        return [names[j] for j in self.sparse_index]

    def update_basis(self, sparse_index: Sequence[int]) -> None:
        sparse_index = tuple(int(i) for i in sparse_index)
        assert self._num_features_full >= max(sparse_index) + 1, (
            "More sparsity inducing indices than features."
        )
        self.sparse_index = sparse_index

    def __str__(self) -> str:
        return " + ".join(self.feature_names)

    # --- forward (Pallas) ----------------------------------------------------
    def __call__(
        self,
        x: jax.Array,
        *,
        tile_n: int = None,
        transposed_output: bool = False,
        out_dtype=jnp.float32,
    ) -> jax.Array:
        assert x.ndim == 2
        N, d = x.shape
        assert d == self.d
        in_dtype = np.dtype(x.dtype)
        out_dtype = np.dtype(out_dtype)
        F = len(self.sparse_index)
        if tile_n is None:
            tile_n = _pick_tile_batch(N, d, F, in_dtype, out_dtype)
        else:
            slab = max(_native_sublanes(in_dtype), _native_sublanes(out_dtype))
            tile_n = _round_up(int(tile_n), slab * _LANES)
        fwd = _build_forward(
            self.combos,
            self.sparse_index,
            self.d,
            int(tile_n),
            bool(transposed_output),
            in_dtype,
            out_dtype,
        )
        return fwd(x)

    def apply_weights(self, x: jax.Array, w: jax.Array, **kw) -> jax.Array:
        """Fused consumer: Phi(x) @ w using the transposed (F, N) fast path."""
        phi_t = self(x, transposed_output=True, **kw)  # (F, N), no wrapper transpose
        return (w.T @ phi_t).T  # (N,) or (N, K)


def _reference(x: np.ndarray, combos, keep) -> np.ndarray:
    """Pure-numpy reference for correctness checking."""
    N = x.shape[0]
    cols = [np.ones((N,), np.float64)]
    for combo in combos:
        c = np.ones((N,), np.float64)
        for idx in combo:
            c = c * x[:, idx].astype(np.float64)
        cols.append(c)
    full = np.stack(cols, axis=-1)
    return full[:, list(keep)].astype(np.float32)


if __name__ == "__main__":
    key = jax.random.PRNGKey(0)
    N, d, degree = 200, 4, 3  # F = 1 + 4 + 10 + 20 = 35; N not a tile multiple
    x = jax.random.normal(key, (N, d), dtype=jnp.float32)

    lib = SparsePolynomialFeatures(d, degree)

    # Dense basis, default (N, F) contract (pads N internally, slices back).
    phi = jax.block_until_ready(lib(x))
    ref = _reference(np.asarray(x), lib.combos, lib.sparse_index)
    np.testing.assert_allclose(np.asarray(phi), ref, rtol=1e-5, atol=1e-5)
    assert phi.shape == (N, lib.num_features)

    # Transposed fast path (Phi^T, writeback-optimal; no wrapper transpose).
    phi_t = jax.block_until_ready(lib(x, transposed_output=True))
    np.testing.assert_allclose(np.asarray(phi_t).T, ref, rtol=1e-5, atol=1e-5)

    # Sparse basis via update_basis (bounded compile cache, no churn on reuse).
    lib.update_basis([0, 2, 5, 9, 14, 20, 34])
    ref_s = _reference(np.asarray(x), lib.combos, lib.sparse_index)
    phi_s = jax.block_until_ready(lib(x))
    np.testing.assert_allclose(np.asarray(phi_s), ref_s, rtol=1e-5, atol=1e-5)
    assert phi_s.shape == (N, 7)

    # Fused downstream consumer: Phi @ w on the transposed layout.
    w = jax.random.normal(jax.random.PRNGKey(1), (7,), dtype=jnp.float32)
    y = jax.block_until_ready(lib.apply_weights(x, w))
    np.testing.assert_allclose(np.asarray(y), ref_s @ np.asarray(w), rtol=1e-4, atol=1e-4)

    # bf16 input path: stays bf16 in HBM/VMEM; widened to f32 in-kernel.
    xb = x.astype(jnp.bfloat16)
    phi_b = jax.block_until_ready(lib(xb))
    ref_b = _reference(np.asarray(xb.astype(jnp.float32)), lib.combos, lib.sparse_index)
    np.testing.assert_allclose(np.asarray(phi_b), ref_b, rtol=1e-5, atol=1e-5)

    # Opt-in bf16 output: halves HBM writeback (precision trade-off).
    phi_b16 = jax.block_until_ready(lib(x, transposed_output=True, out_dtype=jnp.bfloat16))
    np.testing.assert_allclose(
        np.asarray(phi_b16.astype(jnp.float32)).T, ref_s, rtol=2e-2, atol=2e-2
    )

    # Larger run exercising the multi-step grid + in-kernel slab loop.
    lib2 = SparsePolynomialFeatures(4, 2)  # F = 15
    x2 = jax.random.normal(jax.random.PRNGKey(2), (5000, 4), dtype=jnp.float32)
    phi2 = jax.block_until_ready(lib2(x2))
    ref2 = _reference(np.asarray(x2), lib2.combos, lib2.sparse_index)
    np.testing.assert_allclose(np.asarray(phi2), ref2, rtol=1e-5, atol=1e-5)

    print("KERNEL_OK")
</pallas_src>

<mosaic_0001>
module attributes {stable_mosaic.version = 11 : i64} {
  func.func @kernel(%arg0: i32, %arg1: memref<4x8x128xf32, #tpu.memory_space<vmem>>, %arg2: memref<35x8x128xf32, #tpu.memory_space<vmem>>) attributes {dimension_semantics = [#tpu.dimension_semantics<parallel>], iteration_bounds = array<i64: 1>, scalar_prefetch = 0 : i64, scratch_operands = 0 : i64, tpu.core_type = #tpu.core_type<tc>, window_params = [{transform_indices = @transform_0, window_bounds = array<i64: 4, 8, 128>}, {transform_indices = @transform_1, window_bounds = array<i64: 35, 8, 128>}]} {
    %cst = arith.constant 1.000000e+00 : f32
    %0 = vector.broadcast %cst : f32 to vector<8x128xf32>
    %c0 = arith.constant 0 : index
    %c0_0 = arith.constant 0 : index
    %c0_1 = arith.constant 0 : index
    %1 = vector.load %arg2[%c0, %c0_0, %c0_1] : memref<35x8x128xf32, #tpu.memory_space<vmem>>, vector<1x8x128xf32>
    %2 = vector.shape_cast %1 : vector<1x8x128xf32> to vector<8x128xf32>
    %3 = vector.shape_cast %0 : vector<8x128xf32> to vector<1x8x128xf32>
    tpu.vector_store %arg2[%c0, %c0_0, %c0_1], %3 {strides = array<i32>} : memref<35x8x128xf32, #tpu.memory_space<vmem>>, vector<1x8x128xf32>,
    %c0_2 = arith.constant 0 : index
    %c0_3 = arith.constant 0 : index
    %c0_4 = arith.constant 0 : index
    %4 = vector.load %arg1[%c0_2, %c0_3, %c0_4] : memref<4x8x128xf32, #tpu.memory_space<vmem>>, vector<1x8x128xf32>
    %5 = vector.shape_cast %4 : vector<1x8x128xf32> to vector<8x128xf32>
    %c1 = arith.constant 1 : index
    %c0_5 = arith.constant 0 : index
    %c0_6 = arith.constant 0 : index
    %6 = vector.load %arg2[%c1, %c0_5, %c0_6] : memref<35x8x128xf32, #tpu.memory_space<vmem>>, vector<1x8x128xf32>
    %7 = vector.shape_cast %6 : vector<1x8x128xf32> to vector<8x128xf32>
    %8 = vector.shape_cast %5 : vector<8x128xf32> to vector<1x8x128xf32>
    tpu.vector_store %arg2[%c1, %c0_5, %c0_6], %8 {strides = array<i32>} : memref<35x8x128xf32, #tpu.memory_space<vmem>>, vector<1x8x128xf32>,
    %9 = arith.mulf %5, %5 : vector<8x128xf32>
    %c5 = arith.constant 5 : index
    %c0_7 = arith.constant 0 : index
    %c0_8 = arith.constant 0 : index
    %10 = vector.load %arg2[%c5, %c0_7, %c0_8] : memref<35x8x128xf32, #tpu.memory_space<vmem>>, vector<1x8x128xf32>
    %11 = vector.shape_cast %10 : vector<1x8x128xf32> to vector<8x128xf32>
    %12 = vector.shape_cast %9 : vector<8x128xf32> to vector<1x8x128xf32>
    tpu.vector_store %arg2[%c5, %c0_7, %c0_8], %12 {strides = array<i32>} : memref<35x8x128xf32, #tpu.memory_space<vmem>>, vector<1x8x128xf32>,
    %13 = arith.mulf %9, %5 : vector<8x128xf32>
    %c15 = arith.constant 15 : index
    %c0_9 = arith.constant 0 : index
    %c0_10 = arith.constant 0 : index
    %14 = vector.load %arg2[%c15, %c0_9, %c0_10] : memref<35x8x128xf32, #tpu.memory_space<vmem>>, vector<1x8x128xf32>
    %15 = vector.shape_cast %14 : vector<1x8x128xf32> to vector<8x128xf32>
    %16 = vector.shape_cast %13 : vector<8x128xf32> to vector<1x8x128xf32>
    tpu.vector_store %arg2[%c15, %c0_9, %c0_10], %16 {strides = array<i32>} : memref<35x8x128xf32, #tpu.memory_space<vmem>>, vector<1x8x128xf32>,
    %c1_11 = arith.constant 1 : index
    %c0_12 = arith.constant 0 : index
    %c0_13 = arith.constant 0 : index
    %17 = vector.load %arg1[%c1_11, %c0_12, %c0_13] : memref<4x8x128xf32, #tpu.memory_space<vmem>>, vector<1x8x128xf32>
    %18 = vector.shape_cast %17 : vector<1x8x128xf32> to vector<8x128xf32>
    %19 = arith.mulf %9, %18 : vector<8x128xf32>
    %c16 = arith.constant 16 : index
    %c0_14 = arith.constant 0 : index
    %c0_15 = arith.constant 0 : index
    %20 = vector.load %arg2[%c16, %c0_14, %c0_15] : memref<35x8x128xf32, #tpu.memory_space<vmem>>, vector<1x8x128xf32>
    %21 = vector.shape_cast %20 : vector<1x8x128xf32> to vector<8x128xf32>
    %22 = vector.shape_cast %19 : vector<8x128xf32> to vector<1x8x128xf32>
    tpu.vector_store %arg2[%c16, %c0_14, %c0_15], %22 {strides = array<i32>} : memref<35x8x128xf32, #tpu.memory_space<vmem>>, vector<1x8x128xf32>,
    %c2 = arith.constant 2 : index
    %c0_16 = arith.constant 0 : index
    %c0_17 = arith.constant 0 : index
    %23 = vector.load %arg1[%c2, %c0_16, %c0_17] : memref<4x8x128xf32, #tpu.memory_space<vmem>>, vector<1x8x128xf32>
    %24 = vector.shape_cast %23 : vector<1x8x128xf32> to vector<8x128xf32>
    %25 = arith.mulf %9, %24 : vector<8x128xf32>
    %c17 = arith.constant 17 : index
    %c0_18 = arith.constant 0 : index
    %c0_19 = arith.constant 0 : index
    %26 = vector.load %arg2[%c17, %c0_18, %c0_19] : memref<35x8x128xf32, #tpu.memory_space<vmem>>, vector<1x8x128xf32>
    %27 = vector.shape_cast %26 : vector<1x8x128xf32> to vector<8x128xf32>
    %28 = vector.shape_cast %25 : vector<8x128xf32> to vector<1x8x128xf32>
    tpu.vector_store %arg2[%c17, %c0_18, %c0_19], %28 {strides = array<i32>} : memref<35x8x128xf32, #tpu.memory_space<vmem>>, vector<1x8x128xf32>,
    %c3 = arith.constant 3 : index
    %c0_20 = arith.constant 0 : index
    %c0_21 = arith.constant 0 : index
    %29 = vector.load %arg1[%c3, %c0_20, %c0_21] : memref<4x8x128xf32, #tpu.memory_space<vmem>>, vector<1x8x128xf32>
    %30 = vector.shape_cast %29 : vector<1x8x128xf32> to vector<8x128xf32>
    %31 = arith.mulf %9, %30 : vector<8x128xf32>
    %c18 = arith.constant 18 : index
    %c0_22 = arith.constant 0 : index
    %c0_23 = arith.constant 0 : index
    %32 = vector.load %arg2[%c18, %c0_22, %c0_23] : memref<35x8x128xf32, #tpu.memory_space<vmem>>, vector<1x8x128xf32>
    %33 = vector.shape_cast %32 : vector<1x8x128xf32> to vector<8x128xf32>
    %34 = vector.shape_cast %31 : vector<8x128xf32> to vector<1x8x128xf32>
    tpu.vector_store %arg2[%c18, %c0_22, %c0_23], %34 {strides = array<i32>} : memref<35x8x128xf32, #tpu.memory_space<vmem>>, vector<1x8x128xf32>,
    %35 = arith.mulf %5, %18 : vector<8x128xf32>
    %c6 = arith.constant 6 : index
    %c0_24 = arith.constant 0 : index
    %c0_25 = arith.constant 0 : index
    %36 = vector.load %arg2[%c6, %c0_24, %c0_25] : memref<35x8x128xf32, #tpu.memory_space<vmem>>, vector<1x8x128xf32>
    %37 = vector.shape_cast %36 : vector<1x8x128xf32> to vector<8x128xf32>
    %38 = vector.shape_cast %35 : vector<8x128xf32> to vector<1x8x128xf32>
    tpu.vector_store %arg2[%c6, %c0_24, %c0_25], %38 {strides = array<i32>} : memref<35x8x128xf32, #tpu.memory_space<vmem>>, vector<1x8x128xf32>,
    %39 = arith.mulf %35, %18 : vector<8x128xf32>
    %c19 = arith.constant 19 : index
    %c0_26 = arith.constant 0 : index
    %c0_27 = arith.constant 0 : index
    %40 = vector.load %arg2[%c19, %c0_26, %c0_27] : memref<35x8x128xf32, #tpu.memory_space<vmem>>, vector<1x8x128xf32>
    %41 = vector.shape_cast %40 : vector<1x8x128xf32> to vector<8x128xf32>
    %42 = vector.shape_cast %39 : vector<8x128xf32> to vector<1x8x128xf32>
    tpu.vector_store %arg2[%c19, %c0_26, %c0_27], %42 {strides = array<i32>} : memref<35x8x128xf32, #tpu.memory_space<vmem>>, vector<1x8x128xf32>,
    %43 = arith.mulf %35, %24 : vector<8x128xf32>
    %c20 = arith.constant 20 : index
    %c0_28 = arith.constant 0 : index
    %c0_29 = arith.constant 0 : index
    %44 = vector.load %arg2[%c20, %c0_28, %c0_29] : memref<35x8x128xf32, #tpu.memory_space<vmem>>, vector<1x8x128xf32>
    %45 = vector.shape_cast %44 : vector<1x8x128xf32> to vector<8x128xf32>
    %46 = vector.shape_cast %43 : vector<8x128xf32> to vector<1x8x128xf32>
    tpu.vector_store %arg2[%c20, %c0_28, %c0_29], %46 {strides = array<i32>} : memref<35x8x128xf32, #tpu.memory_space<vmem>>, vector<1x8x128xf32>,
    %47 = arith.mulf %35, %30 : vector<8x128xf32>
    %c21 = arith.constant 21 : index
    %c0_30 = arith.constant 0 : index
    %c0_31 = arith.constant 0 : index
    %48 = vector.load %arg2[%c21, %c0_30, %c0_31] : memref<35x8x128xf32, #tpu.memory_space<vmem>>, vector<1x8x128xf32>
    %49 = vector.shape_cast %48 : vector<1x8x128xf32> to vector<8x128xf32>
    %50 = vector.shape_cast %47 : vector<8x128xf32> to vector<1x8x128xf32>
    tpu.vector_store %arg2[%c21, %c0_30, %c0_31], %50 {strides = array<i32>} : memref<35x8x128xf32, #tpu.memory_space<vmem>>, vector<1x8x128xf32>,
    %51 = arith.mulf %5, %24 : vector<8x128xf32>
    %c7 = arith.constant 7 : index
    %c0_32 = arith.constant 0 : index
    %c0_33 = arith.constant 0 : index
    %52 = vector.load %arg2[%c7, %c0_32, %c0_33] : memref<35x8x128xf32, #tpu.memory_space<vmem>>, vector<1x8x128xf32>
    %53 = vector.shape_cast %52 : vector<1x8x128xf32> to vector<8x128xf32>
    %54 = vector.shape_cast %51 : vector<8x128xf32> to vector<1x8x128xf32>
    tpu.vector_store %arg2[%c7, %c0_32, %c0_33], %54 {strides = array<i32>} : memref<35x8x128xf32, #tpu.memory_space<vmem>>, vector<1x8x128xf32>,
    %55 = arith.mulf %51, %24 : vector<8x128xf32>
    %c22 = arith.constant 22 : index
    %c0_34 = arith.constant 0 : index
    %c0_35 = arith.constant 0 : index
    %56 = vector.load %arg2[%c22, %c0_34, %c0_35] : memref<35x8x128xf32, #tpu.memory_space<vmem>>, vector<1x8x128xf32>
    %57 = vector.shape_cast %56 : vector<1x8x128xf32> to vector<8x128xf32>
    %58 = vector.shape_cast %55 : vector<8x128xf32> to vector<1x8x128xf32>
    tpu.vector_store %arg2[%c22, %c0_34, %c0_35], %58 {strides = array<i32>} : memref<35x8x128xf32, #tpu.memory_space<vmem>>, vector<1x8x128xf32>,
    %59 = arith.mulf %51, %30 : vector<8x128xf32>
    %c23 = arith.constant 23 : index
    %c0_36 = arith.constant 0 : index
    %c0_37 = arith.constant 0 : index
    %60 = vector.load %arg2[%c23, %c0_36, %c0_37] : memref<35x8x128xf32, #tpu.memory_space<vmem>>, vector<1x8x128xf32>
    %61 = vector.shape_cast %60 : vector<1x8x128xf32> to vector<8x128xf32>
    %62 = vector.shape_cast %59 : vector<8x128xf32> to vector<1x8x128xf32>
    tpu.vector_store %arg2[%c23, %c0_36, %c0_37], %62 {strides = array<i32>} : memref<35x8x128xf32, #tpu.memory_space<vmem>>, vector<1x8x128xf32>,
    %63 = arith.mulf %5, %30 : vector<8x128xf32>
    %c8 = arith.constant 8 : index
    %c0_38 = arith.constant 0 : index
    %c0_39 = arith.constant 0 : index
    %64 = vector.load %arg2[%c8, %c0_38, %c0_39] : memref<35x8x128xf32, #tpu.memory_space<vmem>>, vector<1x8x128xf32>
    %65 = vector.shape_cast %64 : vector<1x8x128xf32> to vector<8x128xf32>
    %66 = vector.shape_cast %63 : vector<8x128xf32> to vector<1x8x128xf32>
    tpu.vector_store %arg2[%c8, %c0_38, %c0_39], %66 {strides = array<i32>} : memref<35x8x128xf32, #tpu.memory_space<vmem>>, vector<1x8x128xf32>,
    %67 = arith.mulf %63, %30 : vector<8x128xf32>
    %c24 = arith.constant 24 : index
    %c0_40 = arith.constant 0 : index
    %c0_41 = arith.constant 0 : index
    %68 = vector.load %arg2[%c24, %c0_40, %c0_41] : memref<35x8x128xf32, #tpu.memory_space<vmem>>, vector<1x8x128xf32>
    %69 = vector.shape_cast %68 : vector<1x8x128xf32> to vector<8x128xf32>
    %70 = vector.shape_cast %67 : vector<8x128xf32> to vector<1x8x128xf32>
    tpu.vector_store %arg2[%c24, %c0_40, %c0_41], %70 {strides = array<i32>} : memref<35x8x128xf32, #tpu.memory_space<vmem>>, vector<1x8x128xf32>,
    %c2_42 = arith.constant 2 : index
    %c0_43 = arith.constant 0 : index
    %c0_44 = arith.constant 0 : index
    %71 = vector.load %arg2[%c2_42, %c0_43, %c0_44] : memref<35x8x128xf32, #tpu.memory_space<vmem>>, vector<1x8x128xf32>
    %72 = vector.shape_cast %71 : vector<1x8x128xf32> to vector<8x128xf32>
    %73 = vector.shape_cast %18 : vector<8x128xf32> to vector<1x8x128xf32>
    tpu.vector_store %arg2[%c2_42, %c0_43, %c0_44], %73 {strides = array<i32>} : memref<35x8x128xf32, #tpu.memory_space<vmem>>, vector<1x8x128xf32>,
    %74 = arith.mulf %18, %18 : vector<8x128xf32>
    %c9 = arith.constant 9 : index
    %c0_45 = arith.constant 0 : index
    %c0_46 = arith.constant 0 : index
    %75 = vector.load %arg2[%c9, %c0_45, %c0_46] : memref<35x8x128xf32, #tpu.memory_space<vmem>>, vector<1x8x128xf32>
    %76 = vector.shape_cast %75 : vector<1x8x128xf32> to vector<8x128xf32>
    %77 = vector.shape_cast %74 : vector<8x128xf32> to vector<1x8x128xf32>
    tpu.vector_store %arg2[%c9, %c0_45, %c0_46], %77 {strides = array<i32>} : memref<35x8x128xf32, #tpu.memory_space<vmem>>, vector<1x8x128xf32>,
    %78 = arith.mulf %74, %18 : vector<8x128xf32>
    %c25 = arith.constant 25 : index
    %c0_47 = arith.constant 0 : index
    %c0_48 = arith.constant 0 : index
    %79 = vector.load %arg2[%c25, %c0_47, %c0_48] : memref<35x8x128xf32, #tpu.memory_space<vmem>>, vector<1x8x128xf32>
    %80 = vector.shape_cast %79 : vector<1x8x128xf32> to vector<8x128xf32>
    %81 = vector.shape_cast %78 : vector<8x128xf32> to vector<1x8x128xf32>
    tpu.vector_store %arg2[%c25, %c0_47, %c0_48], %81 {strides = array<i32>} : memref<35x8x128xf32, #tpu.memory_space<vmem>>, vector<1x8x128xf32>,
    %82 = arith.mulf %74, %24 : vector<8x128xf32>
    %c26 = arith.constant 26 : index
    %c0_49 = arith.constant 0 : index
    %c0_50 = arith.constant 0 : index
    %83 = vector.load %arg2[%c26, %c0_49, %c0_50] : memref<35x8x128xf32, #tpu.memory_space<vmem>>, vector<1x8x128xf32>
    %84 = vector.shape_cast %83 : vector<1x8x128xf32> to vector<8x128xf32>
    %85 = vector.shape_cast %82 : vector<8x128xf32> to vector<1x8x128xf32>
    tpu.vector_store %arg2[%c26, %c0_49, %c0_50], %85 {strides = array<i32>} : memref<35x8x128xf32, #tpu.memory_space<vmem>>, vector<1x8x128xf32>,
    %86 = arith.mulf %74, %30 : vector<8x128xf32>
    %c27 = arith.constant 27 : index
    %c0_51 = arith.constant 0 : index
    %c0_52 = arith.constant 0 : index
    %87 = vector.load %arg2[%c27, %c0_51, %c0_52] : memref<35x8x128xf32, #tpu.memory_space<vmem>>, vector<1x8x128xf32>
    %88 = vector.shape_cast %87 : vector<1x8x128xf32> to vector<8x128xf32>
    %89 = vector.shape_cast %86 : vector<8x128xf32> to vector<1x8x128xf32>
    tpu.vector_store %arg2[%c27, %c0_51, %c0_52], %89 {strides = array<i32>} : memref<35x8x128xf32, #tpu.memory_space<vmem>>, vector<1x8x128xf32>,
    %90 = arith.mulf %18, %24 : vector<8x128xf32>
    %c10 = arith.constant 10 : index
    %c0_53 = arith.constant 0 : index
    %c0_54 = arith.constant 0 : index
    %91 = vector.load %arg2[%c10, %c0_53, %c0_54] : memref<35x8x128xf32, #tpu.memory_space<vmem>>, vector<1x8x128xf32>
    %92 = vector.shape_cast %91 : vector<1x8x128xf32> to vector<8x128xf32>
    %93 = vector.shape_cast %90 : vector<8x128xf32> to vector<1x8x128xf32>
    tpu.vector_store %arg2[%c10, %c0_53, %c0_54], %93 {strides = array<i32>} : memref<35x8x128xf32, #tpu.memory_space<vmem>>, vector<1x8x128xf32>,
    %94 = arith.mulf %90, %24 : vector<8x128xf32>
    %c28 = arith.constant 28 : index
    %c0_55 = arith.constant 0 : index
    %c0_56 = arith.constant 0 : index
    %95 = vector.load %arg2[%c28, %c0_55, %c0_56] : memref<35x8x128xf32, #tpu.memory_space<vmem>>, vector<1x8x128xf32>
    %96 = vector.shape_cast %95 : vector<1x8x128xf32> to vector<8x128xf32>
    %97 = vector.shape_cast %94 : vector<8x128xf32> to vector<1x8x128xf32>
    tpu.vector_store %arg2[%c28, %c0_55, %c0_56], %97 {strides = array<i32>} : memref<35x8x128xf32, #tpu.memory_space<vmem>>, vector<1x8x128xf32>,
    %98 = arith.mulf %90, %30 : vector<8x128xf32>
    %c29 = arith.constant 29 : index
    %c0_57 = arith.constant 0 : index
    %c0_58 = arith.constant 0 : index
    %99 = vector.load %arg2[%c29, %c0_57, %c0_58] : memref<35x8x128xf32, #tpu.memory_space<vmem>>, vector<1x8x128xf32>
    %100 = vector.shape_cast %99 : vector<1x8x128xf32> to vector<8x128xf32>
    %101 = vector.shape_cast %98 : vector<8x128xf32> to vector<1x8x128xf32>
    tpu.vector_store %arg2[%c29, %c0_57, %c0_58], %101 {strides = array<i32>} : memref<35x8x128xf32, #tpu.memory_space<vmem>>, vector<1x8x128xf32>,
    %102 = arith.mulf %18, %30 : vector<8x128xf32>
    %c11 = arith.constant 11 : index
    %c0_59 = arith.constant 0 : index
    %c0_60 = arith.constant 0 : index
    %103 = vector.load %arg2[%c11, %c0_59, %c0_60] : memref<35x8x128xf32, #tpu.memory_space<vmem>>, vector<1x8x128xf32>
    %104 = vector.shape_cast %103 : vector<1x8x128xf32> to vector<8x128xf32>
    %105 = vector.shape_cast %102 : vector<8x128xf32> to vector<1x8x128xf32>
    tpu.vector_store %arg2[%c11, %c0_59, %c0_60], %105 {strides = array<i32>} : memref<35x8x128xf32, #tpu.memory_space<vmem>>, vector<1x8x128xf32>,
    %106 = arith.mulf %102, %30 : vector<8x128xf32>
    %c30 = arith.constant 30 : index
    %c0_61 = arith.constant 0 : index
    %c0_62 = arith.constant 0 : index
    %107 = vector.load %arg2[%c30, %c0_61, %c0_62] : memref<35x8x128xf32, #tpu.memory_space<vmem>>, vector<1x8x128xf32>
    %108 = vector.shape_cast %107 : vector<1x8x128xf32> to vector<8x128xf32>
    %109 = vector.shape_cast %106 : vector<8x128xf32> to vector<1x8x128xf32>
    tpu.vector_store %arg2[%c30, %c0_61, %c0_62], %109 {strides = array<i32>} : memref<35x8x128xf32, #tpu.memory_space<vmem>>, vector<1x8x128xf32>,
    %c3_63 = arith.constant 3 : index
    %c0_64 = arith.constant 0 : index
    %c0_65 = arith.constant 0 : index
    %110 = vector.load %arg2[%c3_63, %c0_64, %c0_65] : memref<35x8x128xf32, #tpu.memory_space<vmem>>, vector<1x8x128xf32>
    %111 = vector.shape_cast %110 : vector<1x8x128xf32> to vector<8x128xf32>
    %112 = vector.shape_cast %24 : vector<8x128xf32> to vector<1x8x128xf32>
    tpu.vector_store %arg2[%c3_63, %c0_64, %c0_65], %112 {strides = array<i32>} : memref<35x8x128xf32, #tpu.memory_space<vmem>>, vector<1x8x128xf32>,
    %113 = arith.mulf %24, %24 : vector<8x128xf32>
    %c12 = arith.constant 12 : index
    %c0_66 = arith.constant 0 : index
    %c0_67 = arith.constant 0 : index
    %114 = vector.load %arg2[%c12, %c0_66, %c0_67] : memref<35x8x128xf32, #tpu.memory_space<vmem>>, vector<1x8x128xf32>
    %115 = vector.shape_cast %114 : vector<1x8x128xf32> to vector<8x128xf32>
    %116 = vector.shape_cast %113 : vector<8x128xf32> to vector<1x8x128xf32>
    tpu.vector_store %arg2[%c12, %c0_66, %c0_67], %116 {strides = array<i32>} : memref<35x8x128xf32, #tpu.memory_space<vmem>>, vector<1x8x128xf32>,
    %117 = arith.mulf %113, %24 : vector<8x128xf32>
    %c31 = arith.constant 31 : index
    %c0_68 = arith.constant 0 : index
    %c0_69 = arith.constant 0 : index
    %118 = vector.load %arg2[%c31, %c0_68, %c0_69] : memref<35x8x128xf32, #tpu.memory_space<vmem>>, vector<1x8x128xf32>
    %119 = vector.shape_cast %118 : vector<1x8x128xf32> to vector<8x128xf32>
    %120 = vector.shape_cast %117 : vector<8x128xf32> to vector<1x8x128xf32>
    tpu.vector_store %arg2[%c31, %c0_68, %c0_69], %120 {strides = array<i32>} : memref<35x8x128xf32, #tpu.memory_space<vmem>>, vector<1x8x128xf32>,
    %121 = arith.mulf %113, %30 : vector<8x128xf32>
    %c32 = arith.constant 32 : index
    %c0_70 = arith.constant 0 : index
    %c0_71 = arith.constant 0 : index
    %122 = vector.load %arg2[%c32, %c0_70, %c0_71] : memref<35x8x128xf32, #tpu.memory_space<vmem>>, vector<1x8x128xf32>
    %123 = vector.shape_cast %122 : vector<1x8x128xf32> to vector<8x128xf32>
    %124 = vector.shape_cast %121 : vector<8x128xf32> to vector<1x8x128xf32>
    tpu.vector_store %arg2[%c32, %c0_70, %c0_71], %124 {strides = array<i32>} : memref<35x8x128xf32, #tpu.memory_space<vmem>>, vector<1x8x128xf32>,
    %125 = arith.mulf %24, %30 : vector<8x128xf32>
    %c13 = arith.constant 13 : index
    %c0_72 = arith.constant 0 : index
    %c0_73 = arith.constant 0 : index
    %126 = vector.load %arg2[%c13, %c0_72, %c0_73] : memref<35x8x128xf32, #tpu.memory_space<vmem>>, vector<1x8x128xf32>
    %127 = vector.shape_cast %126 : vector<1x8x128xf32> to vector<8x128xf32>
    %128 = vector.shape_cast %125 : vector<8x128xf32> to vector<1x8x128xf32>
    tpu.vector_store %arg2[%c13, %c0_72, %c0_73], %128 {strides = array<i32>} : memref<35x8x128xf32, #tpu.memory_space<vmem>>, vector<1x8x128xf32>,
    %129 = arith.mulf %125, %30 : vector<8x128xf32>
    %c33 = arith.constant 33 : index
    %c0_74 = arith.constant 0 : index
    %c0_75 = arith.constant 0 : index
    %130 = vector.load %arg2[%c33, %c0_74, %c0_75] : memref<35x8x128xf32, #tpu.memory_space<vmem>>, vector<1x8x128xf32>
    %131 = vector.shape_cast %130 : vector<1x8x128xf32> to vector<8x128xf32>
    %132 = vector.shape_cast %129 : vector<8x128xf32> to vector<1x8x128xf32>
    tpu.vector_store %arg2[%c33, %c0_74, %c0_75], %132 {strides = array<i32>} : memref<35x8x128xf32, #tpu.memory_space<vmem>>, vector<1x8x128xf32>,
    %c4 = arith.constant 4 : index
    %c0_76 = arith.constant 0 : index
    %c0_77 = arith.constant 0 : index
    %133 = vector.load %arg2[%c4, %c0_76, %c0_77] : memref<35x8x128xf32, #tpu.memory_space<vmem>>, vector<1x8x128xf32>
    %134 = vector.shape_cast %133 : vector<1x8x128xf32> to vector<8x128xf32>
    %135 = vector.shape_cast %30 : vector<8x128xf32> to vector<1x8x128xf32>
    tpu.vector_store %arg2[%c4, %c0_76, %c0_77], %135 {strides = array<i32>} : memref<35x8x128xf32, #tpu.memory_space<vmem>>, vector<1x8x128xf32>,
    %136 = arith.mulf %30, %30 : vector<8x128xf32>
    %c14 = arith.constant 14 : index
    %c0_78 = arith.constant 0 : index
    %c0_79 = arith.constant 0 : index
    %137 = vector.load %arg2[%c14, %c0_78, %c0_79] : memref<35x8x128xf32, #tpu.memory_space<vmem>>, vector<1x8x128xf32>
    %138 = vector.shape_cast %137 : vector<1x8x128xf32> to vector<8x128xf32>
    %139 = vector.shape_cast %136 : vector<8x128xf32> to vector<1x8x128xf32>
    tpu.vector_store %arg2[%c14, %c0_78, %c0_79], %139 {strides = array<i32>} : memref<35x8x128xf32, #tpu.memory_space<vmem>>, vector<1x8x128xf32>,
    %140 = arith.mulf %136, %30 : vector<8x128xf32>
    %c34 = arith.constant 34 : index
    %c0_80 = arith.constant 0 : index
    %c0_81 = arith.constant 0 : index
    %141 = vector.load %arg2[%c34, %c0_80, %c0_81] : memref<35x8x128xf32, #tpu.memory_space<vmem>>, vector<1x8x128xf32>
    %142 = vector.shape_cast %141 : vector<1x8x128xf32> to vector<8x128xf32>
    %143 = vector.shape_cast %140 : vector<8x128xf32> to vector<1x8x128xf32>
    tpu.vector_store %arg2[%c34, %c0_80, %c0_81], %143 {strides = array<i32>} : memref<35x8x128xf32, #tpu.memory_space<vmem>>, vector<1x8x128xf32>,
    return
  }
  func.func @transform_0(%arg0: i32) -> (i32, i32, i32) {
    %c0_i32 = arith.constant 0 : i32
    %c0_i32_0 = arith.constant 0 : i32
    %c0_i32_1 = arith.constant 0 : i32
    return %c0_i32, %arg0, %c0_i32_0 : i32, i32, i32
  }
  func.func @transform_1(%arg0: i32) -> (i32, i32, i32) {
    %c0_i32 = arith.constant 0 : i32
    %c0_i32_0 = arith.constant 0 : i32
    %c0_i32_1 = arith.constant 0 : i32
    return %c0_i32, %arg0, %c0_i32_0 : i32, i32, i32
  }
}

</mosaic_0001>

<bundles_post_ra>
// kernel: fwd.1
= control target key start
LH: loop header
LB: loop body
LE: loop exit
PB: predicated region body
PF: predicated region fallthrough
CT: control target
= control target key end

     0   :  { %v156_v0 = vmov 1.0   ;;  %s284_s1 = inlined_call_operand.vmem [shape: f32[35,8,128], index: 1, kind: output, shape index: {}]   ;;  %s285_s0 = inlined_call_operand.vmem [shape: f32[4,8,128], index: 0, kind: input, shape index: {}]  }
   0x1   :  { %8 = vst [vmem:[%s284_s1] sm:$0xff] %v156_v0  ;;  %v9_v1 = vld [vmem:[%s285_s0] sm:$0xff]  ;;  %v121_v2 = vld [vmem:[%s285_s0 + $0x8] sm:$0xff]  ;;  %v123_v3 = vld [vmem:[%s285_s0 + $0x10] sm:$0xff] }
   0x2   :  { %118 = vst [vmem:[%s284_s1 + $0x8] sm:$0xff] %v9_v1  ;;  %v125_v4 = vld [vmem:[%s285_s0 + $0x18] sm:$0xff]  ;;  %136 = vst [vmem:[%s284_s1 + $0x10] sm:$0xff] %v121_v2  ;;  %v12_v5 = vmul.f32 %v9_v1, %v9_v1  ;;  %v33_v6 = vmul.f32 %v121_v2, %v9_v1  ;;  %v45_v7 = vmul.f32 %v123_v3, %v9_v1 }
   0x3   :  { %146 = vst [vmem:[%s284_s1 + $0x18] sm:$0xff] %v123_v3  ;;  %v62_v8 = vmul.f32 %v121_v2, %v121_v2  ;;  %152 = vst [vmem:[%s284_s1 + $0x20] sm:$0xff] %v125_v4  ;;  %v54_v9 = vmul.f32 %v125_v4, %v9_v1  ;;  %v74_v10 = vmul.f32 %v123_v3, %v121_v2 }
   0x4   :  { %v83_v11 = vmul.f32 %v125_v4, %v121_v2  ;;  %v91_v12 = vmul.f32 %v123_v3, %v123_v3  ;;  %119 = vst [vmem:[%s284_s1 + $0x28] sm:$0xff] %v12_v5  ;;  %v15_v13 = vmul.f32 %v12_v5, %v9_v1  ;;  %v20_v14 = vmul.f32 %v121_v2, %v12_v5 }
   0x5   :  { %v25_v15 = vmul.f32 %v123_v3, %v12_v5  ;;  %v30_v16 = vmul.f32 %v125_v4, %v12_v5  ;;  %127 = vst [vmem:[%s284_s1 + $0x30] sm:$0xff] %v33_v6  ;;  %131 = vst [vmem:[%s284_s1 + $0x38] sm:$0xff] %v45_v7  ;;  %v36_v17 = vmul.f32 %v121_v2, %v33_v6 }
   0x6   :  { %137 = vst [vmem:[%s284_s1 + $0x48] sm:$0xff] %v62_v8  ;;  %v39_v18 = vmul.f32 %v123_v3, %v33_v6  ;;  %v42_v19 = vmul.f32 %v125_v4, %v33_v6  ;;  %v48_v20 = vmul.f32 %v123_v3, %v45_v7  ;;  %134 = vst [vmem:[%s284_s1 + $0x40] sm:$0xff] %v54_v9 }
   0x7   :  { %141 = vst [vmem:[%s284_s1 + $0x50] sm:$0xff] %v74_v10  ;;  %144 = vst [vmem:[%s284_s1 + $0x58] sm:$0xff] %v83_v11  ;;  %v51_v21 = vmul.f32 %v125_v4, %v45_v7  ;;  %v57_v22 = vmul.f32 %v125_v4, %v54_v9  ;;  %v65_v23 = vmul.f32 %v121_v2, %v62_v8 }
   0x8   :  { %147 = vst [vmem:[%s284_s1 + $0x60] sm:$0xff] %v91_v12  ;;  %120 = vst [vmem:[%s284_s1 + $0x78] sm:$0xff] %v15_v13  ;;  %v68_v24 = vmul.f32 %v123_v3, %v62_v8  ;;  %v71_v25 = vmul.f32 %v125_v4, %v62_v8  ;;  %v77_v26 = vmul.f32 %v123_v3, %v74_v10 }
   0x9   :  { %122 = vst [vmem:[%s284_s1 + $0x80] sm:$0xff] %v20_v14  ;;  %124 = vst [vmem:[%s284_s1 + $0x88] sm:$0xff] %v25_v15  ;;  %v80_v27 = vmul.f32 %v125_v4, %v74_v10  ;;  %v86_v28 = vmul.f32 %v125_v4, %v83_v11  ;;  %v94_v29 = vmul.f32 %v123_v3, %v91_v12 }
   0xa   :  { %126 = vst [vmem:[%s284_s1 + $0x90] sm:$0xff] %v30_v16  ;;  %128 = vst [vmem:[%s284_s1 + $0x98] sm:$0xff] %v36_v17  ;;  %v97_v30 = vmul.f32 %v125_v4, %v91_v12  ;;  %v100_v31 = vmul.f32 %v125_v4, %v123_v3  ;;  %v108_v32 = vmul.f32 %v125_v4, %v125_v4 }
   0xb   :  { %129 = vst [vmem:[%s284_s1 + $0xa0] sm:$0xff] %v39_v18  ;;  %130 = vst [vmem:[%s284_s1 + $0xa8] sm:$0xff] %v42_v19 }
   0xc   :  { %132 = vst [vmem:[%s284_s1 + $0xb0] sm:$0xff] %v48_v20  ;;  %133 = vst [vmem:[%s284_s1 + $0xb8] sm:$0xff] %v51_v21  ;;  %v103_v33 = vmul.f32 %v125_v4, %v100_v31  ;;  %v111_v34 = vmul.f32 %v125_v4, %v108_v32 }
   0xd   :  { %135 = vst [vmem:[%s284_s1 + $0xc0] sm:$0xff] %v57_v22  ;;  %138 = vst [vmem:[%s284_s1 + $0xc8] sm:$0xff] %v65_v23 }
   0xe   :  { %139 = vst [vmem:[%s284_s1 + $0xd0] sm:$0xff] %v68_v24  ;;  %140 = vst [vmem:[%s284_s1 + $0xd8] sm:$0xff] %v71_v25 }
   0xf   :  { %142 = vst [vmem:[%s284_s1 + $0xe0] sm:$0xff] %v77_v26  ;;  %143 = vst [vmem:[%s284_s1 + $0xe8] sm:$0xff] %v80_v27 }
  0x10   :  { %145 = vst [vmem:[%s284_s1 + $0xf0] sm:$0xff] %v86_v28  ;;  %148 = vst [vmem:[%s284_s1 + $0xf8] sm:$0xff] %v94_v29 }
  0x11   :  { %149 = vst [vmem:[%s284_s1 + $0x100] sm:$0xff] %v97_v30  ;;  %150 = vst [vmem:[%s284_s1 + $0x68] sm:$0xff] %v100_v31 }
  0x12   :  { %153 = vst [vmem:[%s284_s1 + $0x70] sm:$0xff] %v108_v32  ;;  %151 = vst [vmem:[%s284_s1 + $0x108] sm:$0xff] %v103_v33 }
  0x13   :  { %154 = vst [vmem:[%s284_s1 + $0x110] sm:$0xff] %v111_v34 }

</bundles_post_ra>
